<compile_context>
chip_gen: v5e
topology: v5e:2x2
jax: 0.10.0
libtpu: 0.0.40
codegen_flags: <defaults>
</compile_context>

<pallas_src>
from functools import partial

import jax
import jax.numpy as jnp
from jax import lax
from jax.experimental import pallas as pl
from jax.experimental.pallas import tpu as pltpu

EPS = 1e-5  # nn.GroupNorm default


# ------------------------ VMEM / tile budgeting -----------------------------
def _vmem_capacity_bytes():
    """Generation-aware VMEM capacity (v5e/v6e: 128 MiB, v7x: 64 MiB)."""
    try:
        info = pltpu.get_tpu_info()
        cap = getattr(info, "vmem_capacity_bytes", None)
        if cap:
            return int(cap)
    except Exception:
        pass
    return 64 * 1024 * 1024  # conservative default (v7x per-core VMEM)


def _pick_hw_tile(HW, C, bytes_in, bytes_out, budget, requested=None):
    """Largest multiple-of-128 divisor of HW whose double-buffered working set
    (in + out tiles plus the resident weight) stays under `budget`."""
    if requested is not None:
        if HW % requested != 0:
            raise ValueError(f"hw_tile {requested} must divide HW {HW}")
        if requested != HW and requested % 128 != 0:
            raise ValueError(f"hw_tile {requested} must be a multiple of 128")
        return requested
    per_lane = 2 * C * (bytes_in + bytes_out)            # double-buffered in+out
    max_thw = max(128, (budget - 2 * C * C * 4) // max(per_lane, 1))
    best = 128
    t = 128
    while t <= min(HW, max_thw):
        if HW % t == 0:
            best = t
        t += 128
    return best


# ----------------------- fused single-pass kernel ---------------------------
def _fused_kernel(x_ref, w_ref, gamma_ref, beta_ref, bias_ref, o_ref,
                  *, matmul_dtype):
    # x_ref: (C, HW) whole sample resident in VMEM (batch dim squeezed).
    # w_ref: (C, C) f32 shared 1x1-conv weight; gamma/beta: (1, C) f32;
    # bias_ref: (C, 1) f32.
    x = x_ref[...].astype(jnp.float32)                    # (C, HW)
    n = float(x.shape[0] * x.shape[1])
    xs = jnp.sum(x).reshape(1, 1)
    xss = jnp.sum(x * x).reshape(1, 1)
    mean = xs / n
    var = jnp.maximum(xss / n - mean * mean, 0.0)          # biased, clamped >= 0
    inv = lax.rsqrt(var + EPS)                             # (1, 1)
    scale = gamma_ref[...] * inv                           # (1, C)
    shift = beta_ref[...] - mean * scale                   # (1, C)
    w = w_ref[...]                                         # (C, C) f32
    # TODO(synk): folding gamma*inv into a bf16 weight loses precision when var
    # is tiny; fine for inference at ~2e-2 tol, revisit for training/backward.
    w_fold = (w * scale).astype(matmul_dtype)              # cast once per sample
    b_fold = bias_ref[...] + jnp.sum(w * shift, axis=1, keepdims=True)  # (C, 1)
    y = jnp.dot(w_fold, x.astype(matmul_dtype),
                preferred_element_type=jnp.float32)        # (C, HW)
    o_ref[...] = (y + b_fold).astype(o_ref.dtype)


# --------------------- fallback phase 1: streamed stats ---------------------
def _stats_kernel(x_ref, sum_ref, sumsq_ref, psum_ref, psumsq_ref):
    # x_ref: (C, thw) HW tile of one sample.  Lane-wide partial accumulators;
    # the cross-lane reduce + (1,1) store happen only on the last tile.
    t = pl.program_id(1)

    @pl.when(t == 0)
    def _():
        psum_ref[...] = jnp.zeros_like(psum_ref)
        psumsq_ref[...] = jnp.zeros_like(psumsq_ref)

    x = x_ref[...].astype(jnp.float32)
    psum_ref[...] = psum_ref[...] + jnp.sum(x, axis=0, keepdims=True)
    psumsq_ref[...] = psumsq_ref[...] + jnp.sum(x * x, axis=0, keepdims=True)

    @pl.when(t == pl.num_programs(1) - 1)
    def _():
        sum_ref[...] = jnp.sum(psum_ref[...]).reshape(1, 1)
        sumsq_ref[...] = jnp.sum(psumsq_ref[...]).reshape(1, 1)


# --------------------- fallback phase 2: folded 1x1 conv --------------------
def _apply_kernel(x_ref, w_ref, scale_ref, b_ref, o_ref, w_scratch,
                  *, matmul_dtype):
    # x_ref: (C, thw); w_ref: (C, C) shared f32 weight (stays VMEM-resident);
    # scale_ref: (1, C) per-sample gamma*inv; b_ref: (C, 1) per-sample folded
    # bias.  Weight fold + cast happens once per sample (t == 0).
    t = pl.program_id(1)

    @pl.when(t == 0)
    def _():
        w_scratch[...] = (w_ref[...] * scale_ref[...]).astype(matmul_dtype)

    y = jnp.dot(w_scratch[...], x_ref[...].astype(matmul_dtype),
                preferred_element_type=jnp.float32)
    o_ref[...] = (y + b_ref[...]).astype(o_ref.dtype)


# ------------------------------- wrapper -------------------------------------
def prenorm_conv1x1_forward(x, gamma, beta, conv_w, conv_b,
                            *, matmul_dtype=jnp.bfloat16, hw_tile=None):
    """x: (B, C, H, W) NCHW.  Returns fn(GroupNorm(1, C)(x)) with fn = 1x1 conv."""
    B, C, H, W = x.shape
    HW = H * W
    x3 = x.reshape(B, C, HW)

    capacity = _vmem_capacity_bytes()
    vmem_limit = int(capacity * 0.7)       # ~45 MiB on v7x, ~90 MiB on v5e/v6e
    budget = int(capacity * 0.4)           # pipelined working-set budget

    bytes_in = x.dtype.itemsize
    bytes_out = x.dtype.itemsize
    fused_ws = 2 * C * HW * (bytes_in + bytes_out) + 2 * C * C * 4 + 8 * C * 4

    gamma32 = gamma.astype(jnp.float32)
    beta32 = beta.astype(jnp.float32)
    w32 = conv_w.astype(jnp.float32)
    b32 = conv_b.astype(jnp.float32)

    # TODO(synk): HW not a multiple of 128 that also exceeds the VMEM budget
    # would need padding / lane-folding; here we best-effort route it fused.
    use_fused = hw_tile is None and (fused_ws <= budget or HW % 128 != 0)

    if use_fused:
        out3 = pl.pallas_call(
            partial(_fused_kernel, matmul_dtype=matmul_dtype),
            out_shape=jax.ShapeDtypeStruct((B, C, HW), x.dtype),
            grid_spec=pltpu.PrefetchScalarGridSpec(
                num_scalar_prefetch=0,
                grid=(B,),
                in_specs=[
                    pl.BlockSpec((pl.Squeezed(), C, HW), lambda b: (b, 0, 0)),
                    pl.BlockSpec((C, C), lambda b: (0, 0)),
                    pl.BlockSpec((1, C), lambda b: (0, 0)),
                    pl.BlockSpec((1, C), lambda b: (0, 0)),
                    pl.BlockSpec((C, 1), lambda b: (0, 0)),
                ],
                out_specs=pl.BlockSpec((pl.Squeezed(), C, HW),
                                       lambda b: (b, 0, 0)),
            ),
            compiler_params=pltpu.CompilerParams(
                dimension_semantics=("parallel",),
                vmem_limit_bytes=vmem_limit),
        )(x3, w32, gamma32.reshape(1, C), beta32.reshape(1, C),
          b32.reshape(C, 1))
        return out3.reshape(B, C, H, W)

    # ---------------- fallback: two-phase tiled scheme ----------------
    thw = _pick_hw_tile(HW, C, bytes_in, bytes_out, budget, hw_tile)
    n_hw = HW // thw

    # phase 1: per-sample sum / sum-of-squares over (C, HW)
    xsum, xsumsq = pl.pallas_call(
        _stats_kernel,
        out_shape=(jax.ShapeDtypeStruct((B, 1, 1), jnp.float32),
                   jax.ShapeDtypeStruct((B, 1, 1), jnp.float32)),
        grid_spec=pltpu.PrefetchScalarGridSpec(
            num_scalar_prefetch=0,
            grid=(B, n_hw),
            in_specs=[
                pl.BlockSpec((pl.Squeezed(), C, thw), lambda b, t: (b, 0, t)),
            ],
            out_specs=[
                pl.BlockSpec((pl.Squeezed(), 1, 1), lambda b, t: (b, 0, 0)),
                pl.BlockSpec((pl.Squeezed(), 1, 1), lambda b, t: (b, 0, 0)),
            ],
            scratch_shapes=[pltpu.VMEM((1, thw), jnp.float32),
                            pltpu.VMEM((1, thw), jnp.float32)],
        ),
        compiler_params=pltpu.CompilerParams(
            dimension_semantics=("parallel", "arbitrary"),
            vmem_limit_bytes=vmem_limit),
    )(x3)

    # tiny per-sample fold (no (B,C,C) folded weight in HBM)
    n = float(C * HW)
    mean = xsum[:, 0, 0] / n                                   # (B,)
    var = jnp.maximum(xsumsq[:, 0, 0] / n - mean * mean, 0.0)  # biased, clamped
    inv = lax.rsqrt(var + EPS)                                 # (B,)
    scale = gamma32[None, :] * inv[:, None]                    # (B, C)
    shift = beta32[None, :] - mean[:, None] * scale            # (B, C)
    b_fold = b32[None, :] + jnp.einsum("oc,bc->bo", w32, shift)  # (B, C)

    # phase 2: y = (W * scale_b) @ x_b + b'_b, weight folded in-kernel per b
    out3 = pl.pallas_call(
        partial(_apply_kernel, matmul_dtype=matmul_dtype),
        out_shape=jax.ShapeDtypeStruct((B, C, HW), x.dtype),
        grid_spec=pltpu.PrefetchScalarGridSpec(
            num_scalar_prefetch=0,
            grid=(B, n_hw),
            in_specs=[
                pl.BlockSpec((pl.Squeezed(), C, thw), lambda b, t: (b, 0, t)),
                pl.BlockSpec((C, C), lambda b, t: (0, 0)),
                pl.BlockSpec((pl.Squeezed(), 1, C), lambda b, t: (b, 0, 0)),
                pl.BlockSpec((pl.Squeezed(), C, 1), lambda b, t: (b, 0, 0)),
            ],
            out_specs=pl.BlockSpec((pl.Squeezed(), C, thw),
                                   lambda b, t: (b, 0, t)),
            scratch_shapes=[pltpu.VMEM((C, C), matmul_dtype)],
        ),
        compiler_params=pltpu.CompilerParams(
            dimension_semantics=("parallel", "arbitrary"),
            vmem_limit_bytes=vmem_limit),
    )(x3, w32, scale.reshape(B, 1, C), b_fold.reshape(B, C, 1))
    return out3.reshape(B, C, H, W)


def _reference(x, gamma, beta, conv_w, conv_b):
    xf = x.astype(jnp.float32)
    mean = jnp.mean(xf, axis=(1, 2, 3), keepdims=True)
    var = jnp.mean((xf - mean) ** 2, axis=(1, 2, 3), keepdims=True)
    xn = (xf - mean) * lax.rsqrt(var + EPS)
    xn = xn * gamma.reshape(1, -1, 1, 1) + beta.reshape(1, -1, 1, 1)
    y = jnp.einsum("oc,bchw->bohw", conv_w, xn) + conv_b.reshape(1, -1, 1, 1)
    return y.astype(x.dtype)


if __name__ == "__main__":
    key = jax.random.PRNGKey(0)
    kx, kg, kb, kw, kc = jax.random.split(key, 5)

    B, C, H, W = 2, 4, 16, 16
    x = jax.random.normal(kx, (B, C, H, W), dtype=jnp.float32)

    # GroupNorm affine params (perturbed away from 1/0 to exercise them).
    gamma = 1.0 + 0.1 * jax.random.normal(kg, (C,), dtype=jnp.float32)
    beta = 0.1 * jax.random.normal(kb, (C,), dtype=jnp.float32)

    # fn = 1x1 conv params.
    conv_w = 0.1 * jax.random.normal(kw, (C, C), dtype=jnp.float32)
    conv_b = 0.1 * jax.random.normal(kc, (C,), dtype=jnp.float32)

    ref = _reference(x, gamma, beta, conv_w, conv_b)

    # Primary (fused single-pass) path, bf16 MXU operands.
    out_fused = prenorm_conv1x1_forward(x, gamma, beta, conv_w, conv_b,
                                        matmul_dtype=jnp.bfloat16)
    out_fused = jax.block_until_ready(out_fused)
    assert out_fused.shape == (B, C, H, W)
    assert jnp.allclose(out_fused, ref, atol=2e-2, rtol=2e-2), "fused bf16 mismatch"

    # Fallback (two-phase tiled) path, forced via hw_tile to exercise
    # cross-tile stats accumulation and the per-sample in-kernel weight fold.
    out_tiled = prenorm_conv1x1_forward(x, gamma, beta, conv_w, conv_b,
                                        matmul_dtype=jnp.bfloat16, hw_tile=128)
    out_tiled = jax.block_until_ready(out_tiled)
    assert jnp.allclose(out_tiled, ref, atol=2e-2, rtol=2e-2), "tiled bf16 mismatch"

    # Exact-semantics checks: f32 MXU operands, tight tolerance, both paths.
    out_f32 = prenorm_conv1x1_forward(x, gamma, beta, conv_w, conv_b,
                                      matmul_dtype=jnp.float32)
    out_f32 = jax.block_until_ready(out_f32)
    assert jnp.allclose(out_f32, ref, atol=5e-4, rtol=5e-4), "fused f32 mismatch"

    out_f32_t = prenorm_conv1x1_forward(x, gamma, beta, conv_w, conv_b,
                                        matmul_dtype=jnp.float32, hw_tile=128)
    out_f32_t = jax.block_until_ready(out_f32_t)
    assert jnp.allclose(out_f32_t, ref, atol=5e-4, rtol=5e-4), "tiled f32 mismatch"

    print("KERNEL_OK")
</pallas_src>

<mosaic_0001>
module attributes {stable_mosaic.version = 11 : i64} {
  func.func @_fused_kernel(%arg0: i32, %arg1: memref<1x4x256xf32, #tpu.memory_space<vmem>>, %arg2: memref<4x4xf32, #tpu.memory_space<vmem>>, %arg3: memref<1x4xf32, #tpu.memory_space<vmem>>, %arg4: memref<1x4xf32, #tpu.memory_space<vmem>>, %arg5: memref<4x1xf32, #tpu.memory_space<vmem>>, %arg6: memref<1x4x256xf32, #tpu.memory_space<vmem>>) attributes {dimension_semantics = [#tpu.dimension_semantics<parallel>], iteration_bounds = array<i64: 2>, scalar_prefetch = 0 : i64, scratch_operands = 0 : i64, tpu.core_type = #tpu.core_type<tc>, window_params = [{transform_indices = @transform_0, window_bounds = array<i64: 1, 4, 256>}, {pipeline_mode = #tpu.pipeline_mode<synchronous>, transform_indices = @transform_1, window_bounds = array<i64: 4, 4>}, {pipeline_mode = #tpu.pipeline_mode<synchronous>, transform_indices = @transform_2, window_bounds = array<i64: 1, 4>}, {pipeline_mode = #tpu.pipeline_mode<synchronous>, transform_indices = @transform_3, window_bounds = array<i64: 1, 4>}, {pipeline_mode = #tpu.pipeline_mode<synchronous>, transform_indices = @transform_4, window_bounds = array<i64: 4, 1>}, {transform_indices = @transform_5, window_bounds = array<i64: 1, 4, 256>}]} {
    %c0 = arith.constant 0 : index
    %c0_0 = arith.constant 0 : index
    %c0_1 = arith.constant 0 : index
    %0 = vector.load %arg1[%c0, %c0_0, %c0_1] : memref<1x4x256xf32, #tpu.memory_space<vmem>>, vector<1x4x256xf32>
    %1 = vector.shape_cast %0 : vector<1x4x256xf32> to vector<4x256xf32>
    %2 = vector.shape_cast %1 : vector<4x256xf32> to vector<1x4x256xf32>
    %cst = arith.constant dense<0.000000e+00> : vector<1xf32>
    %3 = vector.multi_reduction <add>, %2, %cst [1, 2] : vector<1x4x256xf32> to vector<1xf32>
    %4 = vector.shape_cast %3 : vector<1xf32> to vector<1x1x1xf32>
    %5 = vector.extract %4[0, 0, 0] : f32 from vector<1x1x1xf32>
    %6 = vector.broadcast %5 : f32 to vector<1x1xf32>
    %7 = arith.mulf %1, %1 : vector<4x256xf32>
    %8 = vector.shape_cast %7 : vector<4x256xf32> to vector<1x4x256xf32>
    %cst_2 = arith.constant dense<0.000000e+00> : vector<1xf32>
    %9 = vector.multi_reduction <add>, %8, %cst_2 [1, 2] : vector<1x4x256xf32> to vector<1xf32>
    %10 = vector.shape_cast %9 : vector<1xf32> to vector<1x1x1xf32>
    %11 = vector.extract %10[0, 0, 0] : f32 from vector<1x1x1xf32>
    %12 = vector.broadcast %11 : f32 to vector<1x1xf32>
    %cst_3 = arith.constant 1.024000e+03 : f32
    %13 = vector.broadcast %cst_3 : f32 to vector<1x1xf32>
    %14 = arith.divf %6, %13 : vector<1x1xf32>
    %cst_4 = arith.constant 1.024000e+03 : f32
    %15 = vector.broadcast %cst_4 : f32 to vector<1x1xf32>
    %16 = arith.divf %12, %15 : vector<1x1xf32>
    %17 = arith.mulf %14, %14 : vector<1x1xf32>
    %18 = arith.subf %16, %17 : vector<1x1xf32>
    %cst_5 = arith.constant 0.000000e+00 : f32
    %19 = vector.broadcast %cst_5 : f32 to vector<1x1xf32>
    %20 = arith.maximumf %18, %19 : vector<1x1xf32>
    %cst_6 = arith.constant 9.99999974E-6 : f32
    %21 = vector.broadcast %cst_6 : f32 to vector<1x1xf32>
    %22 = arith.addf %20, %21 : vector<1x1xf32>
    %23 = math.rsqrt %22 : vector<1x1xf32>
    %c0_7 = arith.constant 0 : index
    %c0_8 = arith.constant 0 : index
    %24 = vector.load %arg3[%c0_7, %c0_8] : memref<1x4xf32, #tpu.memory_space<vmem>>, vector<1x4xf32>
    %25 = vector.broadcast %23 : vector<1x1xf32> to vector<1x4xf32>
    %26 = arith.mulf %24, %25 : vector<1x4xf32>
    %c0_9 = arith.constant 0 : index
    %c0_10 = arith.constant 0 : index
    %27 = vector.load %arg4[%c0_9, %c0_10] : memref<1x4xf32, #tpu.memory_space<vmem>>, vector<1x4xf32>
    %28 = vector.broadcast %14 : vector<1x1xf32> to vector<1x4xf32>
    %29 = arith.mulf %28, %26 : vector<1x4xf32>
    %30 = arith.subf %27, %29 : vector<1x4xf32>
    %c0_11 = arith.constant 0 : index
    %c0_12 = arith.constant 0 : index
    %31 = vector.load %arg2[%c0_11, %c0_12] : memref<4x4xf32, #tpu.memory_space<vmem>>, vector<4x4xf32>
    %32 = vector.broadcast %26 : vector<1x4xf32> to vector<4x4xf32>
    %33 = arith.mulf %31, %32 : vector<4x4xf32>
    %34 = arith.truncf %33 : vector<4x4xf32> to vector<4x4xbf16>
    %c0_13 = arith.constant 0 : index
    %c0_14 = arith.constant 0 : index
    %35 = vector.load %arg5[%c0_13, %c0_14] : memref<4x1xf32, #tpu.memory_space<vmem>>, vector<4x1xf32>
    %36 = vector.broadcast %30 : vector<1x4xf32> to vector<4x4xf32>
    %37 = arith.mulf %31, %36 : vector<4x4xf32>
    %cst_15 = arith.constant dense<0.000000e+00> : vector<4xf32>
    %38 = vector.multi_reduction <add>, %37, %cst_15 [1] : vector<4x4xf32> to vector<4xf32>
    %39 = vector.shape_cast %38 : vector<4xf32> to vector<4x1xf32>
    %40 = arith.addf %35, %39 : vector<4x1xf32>
    %41 = arith.truncf %1 : vector<4x256xf32> to vector<4x256xbf16>
    %cst_16 = arith.constant dense<0.000000e+00> : vector<4x256xf32>
    %42 = tpu.matmul %34, %41, %cst_16 {dimension_numbers = #tpu.dot_dimension_numbers<[1], [0], [0], [1], [0, 0, 1, 1], [], []>} : vector<4x4xbf16>, vector<4x256xbf16>, vector<4x256xf32> -> vector<4x256xf32>
    %43 = vector.broadcast %40 : vector<4x1xf32> to vector<4x256xf32>
    %44 = arith.addf %42, %43 : vector<4x256xf32>
    %c0_17 = arith.constant 0 : index
    %c0_18 = arith.constant 0 : index
    %c0_19 = arith.constant 0 : index
    %45 = vector.load %arg6[%c0_17, %c0_18, %c0_19] : memref<1x4x256xf32, #tpu.memory_space<vmem>>, vector<1x4x256xf32>
    %46 = vector.shape_cast %45 : vector<1x4x256xf32> to vector<4x256xf32>
    %47 = vector.shape_cast %44 : vector<4x256xf32> to vector<1x4x256xf32>
    tpu.vector_store %arg6[%c0_17, %c0_18, %c0_19], %47 {strides = array<i32>} : memref<1x4x256xf32, #tpu.memory_space<vmem>>, vector<1x4x256xf32>,
    return
  }
  func.func @transform_0(%arg0: i32) -> (i32, i32, i32) {
    %c0_i32 = arith.constant 0 : i32
    %c0_i32_0 = arith.constant 0 : i32
    %c0_i32_1 = arith.constant 0 : i32
    return %arg0, %c0_i32, %c0_i32_0 : i32, i32, i32
  }
  func.func @transform_1(%arg0: i32) -> (i32, i32) {
    %c0_i32 = arith.constant 0 : i32
    %c0_i32_0 = arith.constant 0 : i32
    %c0_i32_1 = arith.constant 0 : i32
    return %c0_i32, %c0_i32_0 : i32, i32
  }
  func.func @transform_2(%arg0: i32) -> (i32, i32) {
    %c0_i32 = arith.constant 0 : i32
    %c0_i32_0 = arith.constant 0 : i32
    %c0_i32_1 = arith.constant 0 : i32
    return %c0_i32, %c0_i32_0 : i32, i32
  }
  func.func @transform_3(%arg0: i32) -> (i32, i32) {
    %c0_i32 = arith.constant 0 : i32
    %c0_i32_0 = arith.constant 0 : i32
    %c0_i32_1 = arith.constant 0 : i32
    return %c0_i32, %c0_i32_0 : i32, i32
  }
  func.func @transform_4(%arg0: i32) -> (i32, i32) {
    %c0_i32 = arith.constant 0 : i32
    %c0_i32_0 = arith.constant 0 : i32
    %c0_i32_1 = arith.constant 0 : i32
    return %c0_i32, %c0_i32_0 : i32, i32
  }
  func.func @transform_5(%arg0: i32) -> (i32, i32, i32) {
    %c0_i32 = arith.constant 0 : i32
    %c0_i32_0 = arith.constant 0 : i32
    %c0_i32_1 = arith.constant 0 : i32
    return %arg0, %c0_i32, %c0_i32_0 : i32, i32, i32
  }
}

</mosaic_0001>

<bundles_post_ra>
// kernel: tpu_custom_call.1
= control target key start
LH: loop header
LB: loop body
LE: loop exit
PB: predicated region body
PF: predicated region fallthrough
CT: control target
= control target key end

     0   :  { %10 = vsyncpa [#allocation3], 0  ;;  %s825_s0 = inlined_call_operand.hbm [shape: f32[2,4,256], index: 0, kind: input, shape index: {}]   ;;  %s826_s1 = inlined_call_operand.vmem [shape: f32[4,4], index: 1, kind: input, shape index: {}]   ;;  %s827_s2 = inlined_call_operand.vmem [shape: f32[1,4], index: 2, kind: input, shape index: {}]   ;;  %s828_s3 = inlined_call_operand.vmem [shape: f32[1,4], index: 3, kind: input, shape index: {}]   ;;  %s829_s4 = inlined_call_operand.vmem [shape: f32[4,1], index: 4, kind: input, shape index: {}]   ;;  %s830_s5 = inlined_call_operand.hbm [shape: f32[2,4,256], index: 5, kind: output, shape index: {}]  }
   0x1   :  { %12 = vsyncpa [#allocation3 + $0x1], 0 }
   0x2   :  { %13 = vsyncpa [#allocation4], 0 }
   0x3   :  { %15 = vsyncpa [#allocation4 + $0x1], 0  ;;  %s677_s18 = smov 0   ;;  %s679_s19 = smov 0  }
   0x4   :  { %s681_s20 = smov 0   ;;  %s683_s21 = smov 0  }
   0x5 LB: > { %s698_s22 = sadd.s32 4294967295, %s643_s21   ;;  %s471_s23 = sadd.s32 4294967294, %s643_s21   ;;  %s643_s21 = sphi %s683_s21, %s840_s21   ;;  %s639_s20 = sphi %s681_s20, %s839_s20   ;;  %s635_s19 = sphi %s679_s19, %s838_s19   ;;  %s631_s18 = sphi %s677_s18, %s837_s18  }
   0x6   : > { %s702_s24 = sadd.s32 1, %s643_s21   ;;  %s28_s25 = sadd.s32 1, %s639_s20 }
   0x7   : > { %s25_s26 = ssub.s32 %s643_s21, %s702_s24  ;;  %p35_p0 = scmp.ne.s32.totalorder %s639_s20, %s635_s19 }
   0x8   : > { %p26_p1 = scmp.eq.s32.totalorder %s25_s26, 0  ;;  %p36_p2 = scmp.eq.s32.totalorder %s643_s21, 0 }
   0x9   : > { %p41_p3 = scmp.ne.s32.totalorder %s635_s19, %s631_s18  ;;  %p42_p4 = scmp.eq.s32.totalorder %s698_s22, 0 }
   0xa   : > { %s714_s27 = scalar_select %p26_p1, %s639_s20, %s28_s25  }
   0xb   : > { %p716_p5 = por %p36_p2, %p35_p0  ;;  %p720_p6 = por %p42_p4, %p41_p3 }
   0xc   : > { %p149_p7 = scmp.eq.s32.totalorder %s698_s22, 1  ;;  %p155_p8 = scmp.eq.s32.totalorder %s471_s23, 1 }
   0xd   : > { %p505_p10 = scmp.lt.s32.totalorder %s643_s21, 2  ;;  %s187_s7 = sand.u32 1, %s639_s20  }
   0xe   : > { %p727_p11 = por %p149_p7, %p35_p0  ;;  %p731_p12 = por %p155_p8, %p41_p3 }
   0xf   : > { %s487_s8 = sshll.u32 %s643_s21, 3  ;;  %s474_s9 = sshll.u32 %s187_s7, 3 }
  0x10   : > { %s196_s12 = scalar_lea.hbm %s825_s0, %s487_s8  ;;  %s191_s14 = scalar_lea.vmem [#allocation2], %s474_s9 }
  0x11   : > { %s198_s13 = sshll.u32 %s196_s12, 4  ;;  %s200_s15 = sshll.u32 %s191_s14, 4  ;;  %s199_s13 = int_to_ptr.hbm [resolvable:$true] %s198_s13  ;;  %s201_s15 = int_to_ptr.vmem [resolvable:$true] %s200_s15 }
  0x12   : > { %p742_p13 = pnand %p505_p10, %p716_p5  ;;  %p477_p0 = scmp.ge.s32.totalorder %s643_s21, 1 }
  0x13   : > { %p205_p1 = scmp.lt.s32.totalorder %s643_s21, 3  ;;  %s188_s17 = scalar_lea.sflag [#allocation3], %s187_s7 }
  0x14   : > { %s547_s23 = sshra.s32 %s199_s13, 4  ;;  %p551_p3 = pneg %p742_p13  ;;  %s548_s23 = int_to_ptr.hbm [resolvable:$true] %s547_s23 }
  0x15   : > { %s549_s25 = scalar_lea.hbm %s548_s23, 8  ;;  %s554_s28 = scalar_lea.hbm %s825_s0, 16 }
  0x16   : > { %p550_p2 = scmp.ne.s32.totalorder %s548_s23, %s549_s25  ;;  %p555_p5 = scmp.lt.s32.totalorder %s548_s23, %s825_s0 }
  0x17   : > { %p556_p8 = scmp.lt.s32.totalorder %s554_s28, %s549_s25 }
  0x18   : > { %p552_p4 = pnand %p551_p3, %p550_p2 }
  0x19   : > { %p557_p10 = por %p556_p8, %p555_p5 }
  0x1a   : > { %p553_p7 = pneg %p552_p4 }
  0x1c   : > { %p558_p9 = pnand %p557_p10, %p553_p7 }
  0x1e   : > { %561 = shalt.err (!%p558_p9)
}
  0x1f   : > { %500 = dma.hbm_to_vmem [thread:$0]  (!%p742_p13), %s199_s13, 128, %s201_s15, %s188_s17  }
  0x20   : > { %p206_p2 = pnand %p477_p0, %p205_p1 }
  0x21   : > { %s763_s7 = sand.u32 (!%p206_p2), 1, %s635_s19  }
  0x22   : > { %209 = sbr.rel (%p206_p2) target bundleno = 517 (0x205), region = 40  ;;  %s478_s11 = sshll.u32 (!%p206_p2), %s763_s7, 3 }
  0x23   : > { %s212_s12 = scalar_lea.sflag (!%p206_p2), [#allocation3], %s763_s7  ;;  %s215_s14 = scalar_lea.vmem (!%p206_p2), [#allocation2], %s478_s11 }
  0x27   : > { %622 = dma.done.wait (%p720_p6), %s212_s12, 128  }
  0x28   : > { %624 = vsyncadd (%p720_p6), %s212_s12, 4294967168  ;;  %v244_v0 = vld [vmem:[%s215_s14] sm:$0xff]  ;;  %vm251_vm0 = vcmask 1043456   ;;  %v645_v26 = vmov 1024.0   ;;  %vm345_vm2 = vcmask 1041408   ;;  %vm341_vm6 = vcmask 31744  }
  0x29   : > { %246 = vst [vmem:[#allocation1] ss:$2 sm:$0xff] %v244_v0  ;;  %v265_v1 = vmul.f32 %v244_v0, %v244_v0  ;;  %543 = vrcp.f32 %v645_v26  ;;  %v308_v53 = vld [vmem:[%s827_s2] sm:$0x1]  ;;  %vm324_vm7 = vcmask 27648   ;;  %s488_s9 = sshll.u32 %s698_s22, 3 }
  0x2a   : > { %v313_v56 = vld [vmem:[%s826_s1] sm:$0xf]  ;;  %s396_s14 = scalar_lea.hbm %s830_s5, %s488_s9  ;;  %s385_s16 = scalar_lea.sflag [#allocation4], %s763_s7 }
  0x2b   : > { %v310_v57 = vld [vmem:[%s828_s3] sm:$0x1]  ;;  %s400_s15 = sshll.u32 %s396_s14, 4  ;;  %s401_s15 = int_to_ptr.hbm [resolvable:$true] %s400_s15 }
  0x2c   : > { %s591_s22 = sshra.s32 %s401_s15, 4  ;;  %s592_s22 = int_to_ptr.hbm [resolvable:$true] %s591_s22 }
  0x2d   : > { %s593_s17 = scalar_lea.hbm %s592_s22, 8  ;;  %p598_p0 = scmp.lt.s32.totalorder %s592_s22, %s830_s5 }
  0x2e   : > { %p594_p6 = scmp.ne.s32.totalorder %s592_s22, %s593_s17 }
  0x2f   : > { %v544_v27 = vpop.eup %543 }
  0x30   : > { %v247_v2 = vld.sshfl [vmem:[#allocation1] sm:$0xff pattern:$0x75316420]  ;;  %v248_v3 = vld.sshfl [vmem:[#allocation1 + $0x8] sm:$0xff pattern:$0x75316420]  ;;  %vm290_vm1 = vweird.f32 %v544_v27  ;;  %p595_p9 = pnand %p594_p6, %p727_p11 }
  0x31   : > { %v252_v4 = vsel %vm251_vm0, %v247_v2, 0.0  ;;  %v253_v5 = vsel %vm251_vm0, %v248_v3, 0.0  ;;  %267 = vst [vmem:[#allocation1] ss:$2 sm:$0xff] %v265_v1  ;;  %v286_v28 = vmul.f32 1024.0, %v544_v27  ;;  %v646_v2 = vmov 0  }
  0x32   : > { %v254_v6 = vadd.f32 %v253_v5, %v252_v4  ;;  %541 = vset.pattern.permute.xlu1 %v646_v2  ;;  %542 = vset.pattern.permute.xlu0 %v646_v2  ;;  %v319_v3 = vld [vmem:[%s829_s4] sm:$0xf]  ;;  %p596_p13 = pneg %p595_p9 }
  0x33   : > { %v287_v29 = vsub.f32 1.0, %v286_v28 }
  0x34   : > { %255 = vadd.xlane.f32.xlu0 %v254_v6 }
  0x35   : > { %v288_v30 = vmul.f32 %v544_v27, %v287_v29 }
  0x37   : > { %v289_v31 = vadd.f32 %v544_v27, %v288_v30 }
  0x38   : > { %v268_v7 = vld.sshfl [vmem:[#allocation1] sm:$0xff pattern:$0x75316420]  ;;  %v269_v8 = vld.sshfl [vmem:[#allocation1 + $0x8] sm:$0xff pattern:$0x75316420] }
  0x39   : > { %v272_v9 = vsel %vm251_vm0, %v268_v7, 0.0  ;;  %v273_v10 = vsel %vm251_vm0, %v269_v8, 0.0  ;;  %329 = vst [vmem:[#allocation1] ss:$2 sm:$0xff] %v244_v0  ;;  %v291_v36 = vsel %vm290_vm1, %v544_v27, %v289_v31 }
  0x3a   : > { %v274_v11 = vadd.f32 %v273_v10, %v272_v9 }
  0x3c   : > { %275 = vadd.xlane.f32.xlu0 %v274_v11 }
  0x40   : > { %v330_v32 = vld.sshfl [vmem:[#allocation1] sm:$0xff pattern:$0x75316420]  ;;  %v331_v34 = vld.sshfl [vmem:[#allocation1 + $0x8] sm:$0xff pattern:$0x75316420] }
  0x41   : > { %v334_v33 = vpack.c.bf16 %v330_v32, %v330_v32  ;;  %v335_v37 = vpack.c.bf16 %v331_v34, %v331_v34 }
  0x43   : > { %v347_v38 = vsel %vm345_vm2, %v334_v33, 0  ;;  %v350_v39 = vsel %vm345_vm2, %v335_v37, 0 }
  0x44   : > { %359 = vmatpush.bf16.msra.mxu0 %v347_v38  ;;  %372 = vmatpush.bf16.msra.mxu1 %v350_v39 }
  0xa7   : > { %v256_v12 = vpop.xlane.xlu0 %255 }
  0xa8   : > { %v257_v13 = vrot.slane %v256_v12, 4 }
  0xaa   : > { %v258_v14 = vadd.f32 %v257_v13, %v256_v12 }
  0xac   : > { %v259_v15 = vrot.slane %v258_v14, 2 }
  0xae   : > { %v260_v16 = vadd.f32 %v259_v15, %v258_v14 }
  0xaf   : > { %v276_v17 = vpop.xlane.xlu0 %275 }
  0xb0   : > { %v277_v18 = vrot.slane %v276_v17, 4  ;;  %v261_v19 = vrot.slane %v260_v16, 1 }
  0xb2   : > { %v278_v20 = vadd.f32 %v277_v18, %v276_v17  ;;  %v262_v21 = vadd.f32 %v261_v19, %v260_v16 }
  0xb4   : > { %v279_v22 = vrot.slane %v278_v20, 2  ;;  %489 = vpush %v262_v21 }
  0xb6   : > { %v280_v23 = vadd.f32 %v279_v22, %v278_v20 }
  0xb8   : > { %v281_v24 = vrot.slane %v280_v23, 1 }
  0xba   : > { %v282_v25 = vadd.f32 %v281_v24, %v280_v23 }
  0xbc   : > { %491 = vpush %v282_v25 }
  0xe5   : > { %s490_s29 = spop %489 }
  0xe6   : > { %v264_v35 = vstv %s490_s29  ;;  %s242_s29 = scalar_lea.vmem [#allocation5], %s478_s11  ;;  %s597_s11 = scalar_lea.hbm %s830_s5, 16 }
  0xe7   : > { %v292_v40 = vmul.f32 %v291_v36, %v264_v35  ;;  %p599_p1 = scmp.lt.s32.totalorder %s597_s11, %s593_s17 }
  0xe9   : > { %v294_v42 = vmul.f32 %v292_v40, %v292_v40  ;;  %p600_p3 = por %p599_p1, %p598_p0 }
  0xeb   : > { %p601_p4 = pnand %p600_p3, %p596_p13 }
  0xed   : > { %s492_s13 = spop %491 }
  0xee   : > { %v284_v41 = vstv %s492_s13  ;;  %s398_s13 = sshll.u32 %s242_s29, 4  ;;  %s399_s13 = int_to_ptr.vmem [resolvable:$true] %s398_s13 }
  0xef   : > { %v293_v43 = vmul.f32 %v291_v36, %v284_v41 }
  0xf1   : > { %v295_v44 = vsub.f32 %v293_v43, %v294_v42 }
  0xf3   : > { %v296_v45 = vmax.f32 %v295_v44, 0.0 }
  0xf5   : > { %v297_v46 = vadd.f32 1e-05, %v296_v45 }
  0xf7   : > { %545 = vrsqrt.f32 %v297_v46  ;;  %vm304_vm4 = vweird.f32 %v297_v46 }
  0xfd   : > { %v546_v47 = vpop.eup %545 }
  0xfe   : > { %v299_v48 = vmul.f32 %v546_v47, %v297_v46  ;;  %vm305_vm3 = vweird.f32 %v546_v47 }
  0xff   : > { %vm306_vm5 = vmor %vm304_vm4, %vm305_vm3 }
 0x100   : > { %v300_v49 = vmul.f32 %v546_v47, %v299_v48 }
 0x102   : > { %v301_v50 = vmul.f32 0.5, %v300_v49 }
 0x104   : > { %v302_v51 = vsub.f32 1.5, %v301_v50 }
 0x106   : > { %v303_v52 = vmul.f32 %v546_v47, %v302_v51 }
 0x108   : > { %v307_v54 = vsel %vm306_vm5, %v546_v47, %v303_v52 }
 0x109   : > { %v309_v55 = vmul.f32 %v308_v53, %v307_v54 }
 0x10b   : > { %v315_v58 = vperm.slane %v309_v55, 0  ;;  %v311_v59 = vmul.f32 %v309_v55, %v292_v40 }
 0x10d   : > { %v317_v60 = vmul.f32 %v315_v58, %v313_v56  ;;  %v312_v61 = vsub.f32 %v310_v57, %v311_v59 }
 0x10f   : > { %v318_v62 = vpack.c.bf16 %v317_v60, %v317_v60  ;;  %v321_v63 = vperm.slane %v312_v61, 0 }
 0x111   : > { %480 = vmatmul.msk.bf16.vlgmr.msra.gmra.mxu0 %vm341_vm6, %v318_v62  ;;  %481 = vmatmul.msk.bf16.vlgmr.msra.gmra.mxu1 %vm341_vm6, %v318_v62  ;;  %v323_v0 = vmul.f32 %v321_v63, %v313_v56 }
 0x113   : > { %v325_v1 = vsel %vm324_vm7, %v323_v0, 0.0 }
 0x114   : > { %326 = vadd.xlane.f32.xlu1 %v325_v1 }
 0x187   : > { %v327_v4 = vpop.xlane.xlu1 %326 }
 0x188   : > { %v328_v5 = vadd.f32 %v327_v4, %v319_v3 }
 0x18a   : > { %338 = vperm.xlu1 %541, %v328_v5  }
 0x18e   : > { %v361_v6 = vpop.f32.mrf.mxu0  ;;  %v374_v7 = vpop.f32.mrf.mxu1 }
 0x196   : > { %v363_v8 = vpop.f32.mrf.mxu0  ;;  %v376_v9 = vpop.f32.mrf.mxu1 }
 0x1fc   : > { %v339_v10 = vpop.permute.xlu1 %338 }
 0x1fd   : > { %v375_v11 = vadd.f32 %v374_v7, %v339_v10  ;;  %v362_v12 = vadd.f32 %v361_v6, %v339_v10 }
 0x1ff   : > { %v380_v13 = vrot.slane %v375_v11, 4 }
 0x201   : > { %v381_v14 = vsel %vm251_vm0, %v362_v12, %v380_v13 }
 0x202   : > { %383 = vst [vmem:[%s242_s29] sm:$0xff] %v381_v14 }
 0x203   : > { %604 = shalt.err (!%p601_p4)
}
 0x204   : > { %495 = dma.vmem_to_hbm [thread:$0]  (%p727_p11), %s399_s13, 128, %s401_s15, %s385_s16  }
 0x205 PF: > { %s412_s7 = sand.u32 1, %s631_s18   ;;  %p836_p7 = scmp.ge.s32.totalorder %s643_s21, 2 }
 0x206   : > { %s413_s28 = scalar_lea.sflag [#allocation4], %s412_s7 }
 0x207   : > { %p502_p5 = pnand %p836_p7, %p731_p12 }
 0x209   : > { %p503_p8 = pneg %p502_p5 }
 0x20b   : > { %626 = dma.done.wait (%p503_p8), %s413_s28, 128  }
 0x20c   : > { %628 = vsyncadd (%p503_p8), %s413_s28, 4294967168  ;;  %p18_p10 = scmp.ge.s32.totalorder %s702_s24, 4   ;;  %s837_s18 = smov %s635_s19 }
 0x20d   : > { %s838_s19 = smov %s639_s20  ;;  %s839_s20 = smov %s714_s27 }
 0x20e   : > { %s840_s21 = smov %s702_s24  ;;  %20 = sbr.rel (!%p18_p10) target bundleno = 5 (0x5), region = 85 }
 0x213   :  { %419 = vsyncpa [#allocation3], 1 }
 0x214   :  { %421 = vsyncpa [#allocation3 + $0x1], 1 }
 0x215   :  { %422 = vsyncpa [#allocation4], 1 }
 0x216   :  { %424 = vsyncpa [#allocation4 + $0x1], 1 }

</bundles_post_ra>
